<compile_context>
chip_gen: v5e
topology: v5e:2x2
jax: 0.10.0
libtpu: 0.0.40
codegen_flags: <defaults>
</compile_context>

<pallas_src>
import jax
import jax.numpy as jnp
from jax.experimental import pallas as pl
from jax.experimental.pallas import tpu as pltpu


def _twin_kernel(x_ref, w1t_ref, b1_ref, w2bar_ref, sel_ref, out_ref):
    # x_ref    : (C_in, 2*TB*L)  fused ref/alt positions for this batch tile
    # w1t_ref  : (H, C_in)       W1^T            (resident)
    # b1_ref   : (H, 1)          layer-1 bias    (resident)
    # w2bar_ref: (1, H)          W2.sum(-1)/(L*C_out)   (resident)
    # sel_ref  : (2*TB*L, TB)    +/- block-diagonal "alt - ref, sum over L"
    # out_ref  : (1, 1, TB)      per-batch scalars for this tile (lane dim)
    h = jnp.dot(w1t_ref[...], x_ref[...],
                preferred_element_type=jnp.float32)           # (H, 2*TB*L)
    h = jnp.maximum(h + b1_ref[...], 0.0)                     # ReLU, bias bcast over lanes
    g = jnp.dot(w2bar_ref[...], h,
                preferred_element_type=jnp.float32)           # (1, 2*TB*L)
    out_ref[0] = jnp.dot(g, sel_ref[...],
                         preferred_element_type=jnp.float32)  # (1, TB)


def twin_wrapper_forward(ref, alt, w1, b1, w2, b2, *, tb=8):
    """TwinWrapper forward.

    ref, alt: (B, C_in, L) float32, channels-first (PyTorch Conv1d NCL layout).
    w1: (C_in, H), b1: (H,), w2: (H, C_out), b2: (C_out,).
    Returns (B,) float32.  b2 is accepted for interface parity but cancels
    exactly in the twin difference, so it never reaches the kernel.
    """
    B, C_in, L = ref.shape
    H = w1.shape[1]
    C_out = w2.shape[1]

    # --- batch tiling (pad B to a multiple of TB; padded rows contribute 0) --
    tb = min(tb, B)
    nb = -(-B // tb)
    Bp = nb * tb
    if Bp != B:
        pad = jnp.zeros((Bp - B, C_in, L), ref.dtype)
        ref = jnp.concatenate([ref, pad], axis=0)
        alt = jnp.concatenate([alt, pad], axis=0)

    cols = 2 * tb * L  # fused ref+alt positions per grid step (lane dim)
    assert nb == 1 or cols % 128 == 0, (
        "2*tb*L must be a multiple of 128 lanes (or use a single grid step)")

    # --- wrapper-side layout plumbing (XLA, outside the kernel) --------------
    # Column index within the slab = b*(2L) + which*L + l, which: 0=ref, 1=alt.
    x = jnp.stack([ref, alt], axis=1)                 # (Bp, 2, C_in, L)
    x = jnp.transpose(x, (2, 0, 1, 3))                # (C_in, Bp, 2, L)
    x = x.reshape(C_in, Bp * 2 * L).astype(jnp.float32)

    w1t = jnp.asarray(w1, jnp.float32).T              # (H, C_in)
    b1c = jnp.asarray(b1, jnp.float32).reshape(H, 1)  # (H, 1)
    # b2 cancels; mean over (L, C_out) folds into W2:
    w2bar = (jnp.sum(jnp.asarray(w2, jnp.float32), axis=1)
             / float(L * C_out)).reshape(1, H)        # (1, H)

    # Tile-local selector: out[b] = sum_l g(b, alt, l) - g(b, ref, l).
    r = jnp.arange(cols)
    local_b = r // (2 * L)
    sign = jnp.where((r // L) % 2 == 1, 1.0, -1.0)    # alt -> +1, ref -> -1
    sel = (sign[:, None]
           * (local_b[:, None] == jnp.arange(tb)[None, :])).astype(jnp.float32)

    out = pl.pallas_call(
        _twin_kernel,
        out_shape=jax.ShapeDtypeStruct((nb, 1, tb), jnp.float32),
        grid_spec=pltpu.PrefetchScalarGridSpec(
            num_scalar_prefetch=0,
            grid=(nb,),
            in_specs=[
                pl.BlockSpec((C_in, cols), lambda b: (0, b)),   # x tile
                pl.BlockSpec((H, C_in), lambda b: (0, 0)),      # W1^T  (resident)
                pl.BlockSpec((H, 1), lambda b: (0, 0)),         # b1    (resident)
                pl.BlockSpec((1, H), lambda b: (0, 0)),         # w2bar (resident)
                pl.BlockSpec((cols, tb), lambda b: (0, 0)),     # sel   (resident)
            ],
            out_specs=pl.BlockSpec((1, 1, tb), lambda b: (b, 0, 0)),
        ),
        compiler_params=pltpu.CompilerParams(
            dimension_semantics=("parallel",)),
    )(x, w1t, b1c, w2bar, sel)

    return out.reshape(Bp)[:B]


def _reference_forward(ref, alt, w1, b1, w2, b2):
    """Pure-JAX reference mirroring TwinWrapper.forward semantics (NCL inputs)."""
    def base(x):  # x: (B, C_in, L)
        h = jnp.maximum(jnp.einsum("bcl,ch->blh", x, w1) + b1, 0.0)
        return jnp.einsum("blh,ho->blo", h, w2) + b2
    diff = base(alt) - base(ref)          # (B, L, C_out)
    return diff.mean(axis=(1, 2))         # (B,)


if __name__ == "__main__":
    # Small shapes consistent with the forward: batch=16, input channels=4
    # (DNA one-hot-like), seq len=16, hidden=32, output tracks=8.
    # TB=8 -> grid of 2 even steps (both v7x TensorCores fed).
    B, L, C_in, H, C_out = 16, 16, 4, 32, 8

    key = jax.random.PRNGKey(0)
    k_ref, k_alt, k_w1, k_b1, k_w2, k_b2 = jax.random.split(key, 6)

    ref = jax.random.normal(k_ref, (B, C_in, L), dtype=jnp.float32)
    alt = jax.random.normal(k_alt, (B, C_in, L), dtype=jnp.float32)

    # Deterministic synthetic base-model parameters.
    w1 = 0.1 * jax.random.normal(k_w1, (C_in, H), dtype=jnp.float32)
    b1 = 0.1 * jax.random.normal(k_b1, (H,), dtype=jnp.float32)
    w2 = 0.1 * jax.random.normal(k_w2, (H, C_out), dtype=jnp.float32)
    b2 = 0.1 * jax.random.normal(k_b2, (C_out,), dtype=jnp.float32)

    out = twin_wrapper_forward(ref, alt, w1, b1, w2, b2, tb=8)
    out = jax.block_until_ready(out)

    expected = _reference_forward(ref, alt, w1, b1, w2, b2)
    assert out.shape == (B,)
    # Tolerance covers MXU f32-emulation rounding plus the (exact in real
    # arithmetic) reassociation from folding the mean/b2 into w2bar.
    assert jnp.allclose(out, expected, atol=1e-4, rtol=1e-4), (out, expected)

    # TODO(synk): the real PromoterAI base (dilated residual conv tower) is an
    # injected module; a pointwise 2-layer MLP base is substituted here.
    print("KERNEL_OK")
</pallas_src>

<mosaic_0001>
module attributes {stable_mosaic.version = 11 : i64} {
  func.func @_twin_kernel(%arg0: i32, %arg1: memref<4x256xf32, #tpu.memory_space<vmem>>, %arg2: memref<32x4xf32, #tpu.memory_space<vmem>>, %arg3: memref<32x1xf32, #tpu.memory_space<vmem>>, %arg4: memref<1x32xf32, #tpu.memory_space<vmem>>, %arg5: memref<256x8xf32, #tpu.memory_space<vmem>>, %arg6: memref<1x1x8xf32, #tpu.memory_space<vmem>>) attributes {dimension_semantics = [#tpu.dimension_semantics<parallel>], iteration_bounds = array<i64: 2>, scalar_prefetch = 0 : i64, scratch_operands = 0 : i64, tpu.core_type = #tpu.core_type<tc>, window_params = [{transform_indices = @transform_0, window_bounds = array<i64: 4, 256>}, {pipeline_mode = #tpu.pipeline_mode<synchronous>, transform_indices = @transform_1, window_bounds = array<i64: 32, 4>}, {pipeline_mode = #tpu.pipeline_mode<synchronous>, transform_indices = @transform_2, window_bounds = array<i64: 32, 1>}, {pipeline_mode = #tpu.pipeline_mode<synchronous>, transform_indices = @transform_3, window_bounds = array<i64: 1, 32>}, {pipeline_mode = #tpu.pipeline_mode<synchronous>, transform_indices = @transform_4, window_bounds = array<i64: 256, 8>}, {transform_indices = @transform_5, window_bounds = array<i64: 1, 1, 8>}]} {
    %c0 = arith.constant 0 : index
    %c0_0 = arith.constant 0 : index
    %0 = vector.load %arg2[%c0, %c0_0] : memref<32x4xf32, #tpu.memory_space<vmem>>, vector<32x4xf32>
    %c0_1 = arith.constant 0 : index
    %c0_2 = arith.constant 0 : index
    %1 = vector.load %arg1[%c0_1, %c0_2] : memref<4x256xf32, #tpu.memory_space<vmem>>, vector<4x256xf32>
    %cst = arith.constant dense<0.000000e+00> : vector<32x256xf32>
    %2 = tpu.matmul %0, %1, %cst {dimension_numbers = #tpu.dot_dimension_numbers<[1], [0], [0], [1], [0, 0, 1, 1], [], []>} : vector<32x4xf32>, vector<4x256xf32>, vector<32x256xf32> -> vector<32x256xf32>
    %c0_3 = arith.constant 0 : index
    %c0_4 = arith.constant 0 : index
    %3 = vector.load %arg3[%c0_3, %c0_4] : memref<32x1xf32, #tpu.memory_space<vmem>>, vector<32x1xf32>
    %4 = vector.broadcast %3 : vector<32x1xf32> to vector<32x256xf32>
    %5 = arith.addf %2, %4 : vector<32x256xf32>
    %cst_5 = arith.constant 0.000000e+00 : f32
    %6 = vector.broadcast %cst_5 : f32 to vector<32x256xf32>
    %7 = arith.maximumf %5, %6 : vector<32x256xf32>
    %c0_6 = arith.constant 0 : index
    %c0_7 = arith.constant 0 : index
    %8 = vector.load %arg4[%c0_6, %c0_7] : memref<1x32xf32, #tpu.memory_space<vmem>>, vector<1x32xf32>
    %cst_8 = arith.constant dense<0.000000e+00> : vector<1x256xf32>
    %9 = tpu.matmul %8, %7, %cst_8 {dimension_numbers = #tpu.dot_dimension_numbers<[1], [0], [0], [1], [0, 0, 1, 1], [], []>} : vector<1x32xf32>, vector<32x256xf32>, vector<1x256xf32> -> vector<1x256xf32>
    %c0_9 = arith.constant 0 : index
    %c0_10 = arith.constant 0 : index
    %10 = vector.load %arg5[%c0_9, %c0_10] : memref<256x8xf32, #tpu.memory_space<vmem>>, vector<256x8xf32>
    %cst_11 = arith.constant dense<0.000000e+00> : vector<1x8xf32>
    %11 = tpu.matmul %9, %10, %cst_11 {dimension_numbers = #tpu.dot_dimension_numbers<[1], [0], [0], [1], [0, 0, 1, 1], [], []>} : vector<1x256xf32>, vector<256x8xf32>, vector<1x8xf32> -> vector<1x8xf32>
    %c0_12 = arith.constant 0 : index
    %c0_13 = arith.constant 0 : index
    %c0_14 = arith.constant 0 : index
    %12 = vector.load %arg6[%c0_12, %c0_13, %c0_14] : memref<1x1x8xf32, #tpu.memory_space<vmem>>, vector<1x1x8xf32>
    %13 = vector.shape_cast %12 : vector<1x1x8xf32> to vector<1x8xf32>
    %14 = vector.shape_cast %11 : vector<1x8xf32> to vector<1x1x8xf32>
    tpu.vector_store %arg6[%c0_12, %c0_13, %c0_14], %14 {strides = array<i32>} : memref<1x1x8xf32, #tpu.memory_space<vmem>>, vector<1x1x8xf32>,
    return
  }
  func.func @transform_0(%arg0: i32) -> (i32, i32) {
    %c0_i32 = arith.constant 0 : i32
    %c0_i32_0 = arith.constant 0 : i32
    return %c0_i32, %arg0 : i32, i32
  }
  func.func @transform_1(%arg0: i32) -> (i32, i32) {
    %c0_i32 = arith.constant 0 : i32
    %c0_i32_0 = arith.constant 0 : i32
    %c0_i32_1 = arith.constant 0 : i32
    return %c0_i32, %c0_i32_0 : i32, i32
  }
  func.func @transform_2(%arg0: i32) -> (i32, i32) {
    %c0_i32 = arith.constant 0 : i32
    %c0_i32_0 = arith.constant 0 : i32
    %c0_i32_1 = arith.constant 0 : i32
    return %c0_i32, %c0_i32_0 : i32, i32
  }
  func.func @transform_3(%arg0: i32) -> (i32, i32) {
    %c0_i32 = arith.constant 0 : i32
    %c0_i32_0 = arith.constant 0 : i32
    %c0_i32_1 = arith.constant 0 : i32
    return %c0_i32, %c0_i32_0 : i32, i32
  }
  func.func @transform_4(%arg0: i32) -> (i32, i32) {
    %c0_i32 = arith.constant 0 : i32
    %c0_i32_0 = arith.constant 0 : i32
    %c0_i32_1 = arith.constant 0 : i32
    return %c0_i32, %c0_i32_0 : i32, i32
  }
  func.func @transform_5(%arg0: i32) -> (i32, i32, i32) {
    %c0_i32 = arith.constant 0 : i32
    %c0_i32_0 = arith.constant 0 : i32
    %c0_i32_1 = arith.constant 0 : i32
    return %arg0, %c0_i32, %c0_i32_0 : i32, i32, i32
  }
}

</mosaic_0001>

<bundles_post_ra>
// kernel: tpu_custom_call.1
= control target key start
LH: loop header
LB: loop body
LE: loop exit
PB: predicated region body
PF: predicated region fallthrough
CT: control target
= control target key end

     0   :  { %10 = vsyncpa [#allocation3], 0  ;;  %s898_s0 = inlined_call_operand.vmem [shape: f32[4,512], index: 0, kind: input, shape index: {}]   ;;  %s899_s1 = inlined_call_operand.vmem [shape: f32[32,4], index: 1, kind: input, shape index: {}]   ;;  %s900_s2 = inlined_call_operand.vmem [shape: f32[32,1], index: 2, kind: input, shape index: {}]   ;;  %s901_s3 = inlined_call_operand.vmem [shape: f32[1,32], index: 3, kind: input, shape index: {}]   ;;  %s902_s4 = inlined_call_operand.vmem [shape: f32[256,8], index: 4, kind: input, shape index: {}]   ;;  %s903_s5 = inlined_call_operand.hbm [shape: f32[2,1,8], index: 5, kind: output, shape index: {}]  }
   0x1   :  { %12 = vsyncpa [#allocation3 + $0x1], 0  ;;  %s685_s18 = smov 0   ;;  %s687_s19 = smov 0  }
   0x2   :  { %s689_s20 = smov 0   ;;  %s691_s21 = smov 0  }
   0x3 LB: > { %s706_s22 = sadd.s32 4294967295, %s652_s21   ;;  %s528_s23 = sadd.s32 4294967294, %s652_s21   ;;  %s652_s21 = sphi %s691_s21, %s909_s21   ;;  %s648_s20 = sphi %s689_s20, %s908_s20   ;;  %s644_s19 = sphi %s687_s19, %s907_s19   ;;  %s640_s18 = sphi %s685_s18, %s906_s18  }
   0x4   : > { %s710_s24 = sadd.s32 1, %s652_s21   ;;  %s135_s25 = sadd.s32 1, %s648_s20 }
   0x5   : > { %s132_s26 = ssub.s32 %s652_s21, %s710_s24  ;;  %p145_p0 = scmp.ne.s32.totalorder %s648_s20, %s644_s19 }
   0x6   : > { %p133_p1 = scmp.eq.s32.totalorder %s132_s26, 0  ;;  %p146_p2 = scmp.eq.s32.totalorder %s706_s22, 1 }
   0x7   : > { %p151_p3 = scmp.ne.s32.totalorder %s644_s19, %s640_s18  ;;  %p152_p4 = scmp.eq.s32.totalorder %s528_s23, 1 }
   0x8   : > { %s721_s27 = scalar_select %p133_p1, %s648_s20, %s135_s25  }
   0x9   : > { %p723_p5 = por %p146_p2, %p145_p0  ;;  %p727_p6 = por %p152_p4, %p151_p3 }
   0xa   : > { %p531_p7 = scmp.ge.s32.totalorder %s652_s21, 1  ;;  %p191_p8 = scmp.lt.s32.totalorder %s652_s21, 3 }
   0xc   : > { %p192_p9 = pnand %p531_p7, %p191_p8 }
   0xd   : > { %s532_s30 = sshll.u32 (!%p192_p9), %s706_s22, 1  ;;  %s216_s12 = sand.u32 (!%p192_p9), 1, %s644_s19  }
   0xe   : > { %195 = sbr.rel (%p192_p9) target bundleno = 456 (0x1c8), region = 40  ;;  %p219_p10 = scmp.lt.s32.totalorder (!%p192_p9), %s532_s30, 3 }
   0xf   : > { %s469_s15 = scalar_lea.hbm (!%p192_p9), %s903_s5, %s706_s22  ;;  %s217_s16 = scalar_lea.vmem (!%p192_p9), [#allocation2], %s216_s12 }
  0x10   : > { %s471_s17 = sshll.u32 (!%p192_p9), %s217_s16, 4  ;;  %s473_s23 = sshll.u32 (!%p192_p9), %s469_s15, 4  ;;  %s472_s17 = int_to_ptr.vmem [resolvable:$true] %s471_s17  ;;  %s474_s23 = int_to_ptr.hbm [resolvable:$true] %s473_s23 }
  0x11   : > { %s461_s25 = scalar_lea.sflag (!%p192_p9), [#allocation3], %s216_s12  ;;  %s604_s26 = sshra.s32 (!%p192_p9), %s474_s23, 4  ;;  %s605_s26 = int_to_ptr.hbm [resolvable:$true] %s604_s26 }
  0x12   : > { %s610_s7 = scalar_lea.hbm (!%p192_p9), %s903_s5, 2  ;;  %p611_p0 = scmp.lt.s32.totalorder (!%p192_p9), %s605_s26, %s903_s5 }
  0x13   : > { %v230_v0 = vld [vmem:[%s900_s2 + $0x8] sm:$0xff]  ;;  %v654_v1 = vmov 0   ;;  %v232_v2 = vld [vmem:[%s900_s2 + $0x18] sm:$0xff]  ;;  %s911_s30 = smov (!%p219_p10, %s532_s30), 3  ;;  %v229_v4 = vld [vmem:[%s900_s2] sm:$0xff]  ;;  %vm270_vm0 = vcmask 1043456  }
  0x14   : > { %589 = vset.pattern.permute.xlu1 %v654_v1  ;;  %588 = vset.pattern.permute.xlu0 %v654_v1  ;;  %s533_s10 = sshll.u32 %s911_s30, 2  ;;  %v231_v5 = vld [vmem:[%s900_s2 + $0x10] sm:$0xff]  ;;  %v224_v6 = vld [vmem:[%s899_s1] sm:$0xff]  ;;  %vm257_vm1 = vcmask 31744   ;;  %v225_v9 = vld [vmem:[%s899_s1 + $0x8] sm:$0xff]  ;;  %vm342_vm2 = vcmask 261120  }
  0x15   : > { %240 = vperm.xlu1 %589, %v230_v0   ;;  %250 = vperm.xlu0 %588, %v232_v2   ;;  %s222_s13 = scalar_lea.vmem %s898_s0, %s533_s10  ;;  %v226_v10 = vld [vmem:[%s899_s1 + $0x10] sm:$0xff]  ;;  %v227_v11 = vld [vmem:[%s899_s1 + $0x18] sm:$0xff]  ;;  %v399_v18 = vld [vmem:[%s902_s4 + $0x68] sm:$0xff]  ;;  %vm458_vm3 = vcmask 57344   ;;  %s606_s30 = scalar_lea.hbm %s605_s26, 1 }
  0x16   : > { %v228_v3 = vld [vmem:[%s222_s13] sm:$0xff]  ;;  %v401_v14 = vld [vmem:[%s902_s4 + $0x78] sm:$0xff]  ;;  %v400_v16 = vld [vmem:[%s902_s4 + $0x70] sm:$0xff]  ;;  %p607_p11 = scmp.ne.s32.totalorder %s605_s26, %s606_s30  ;;  %p612_p1 = scmp.lt.s32.totalorder %s610_s7, %s606_s30 }
  0x17   : > { %254 = vst [vmem:[#allocation1] ss:$2 sm:$0xff] %v228_v3  ;;  %v417_v15 = vld [vmem:[%s902_s4 + $0xf8] sm:$0xff]  ;;  %v416_v17 = vld [vmem:[%s902_s4 + $0xf0] sm:$0xff]  ;;  %v415_v19 = vld [vmem:[%s902_s4 + $0xe8] sm:$0xff] }
  0x18   : > { %v398_v22 = vld [vmem:[%s902_s4 + $0x60] sm:$0xff]  ;;  %v397_v24 = vld [vmem:[%s902_s4 + $0x58] sm:$0xff]  ;;  %v396_v27 = vld [vmem:[%s902_s4 + $0x50] sm:$0xff]  ;;  %p608_p12 = pnand %p607_p11, %p723_p5  ;;  %p613_p2 = por %p612_p1, %p611_p0 }
  0x19   : > { %v414_v23 = vld [vmem:[%s902_s4 + $0xe0] sm:$0xff]  ;;  %v413_v25 = vld [vmem:[%s902_s4 + $0xd8] sm:$0xff]  ;;  %v412_v28 = vld [vmem:[%s902_s4 + $0xd0] sm:$0xff] }
  0x1a   : > { %v395_v29 = vld [vmem:[%s902_s4 + $0x48] sm:$0xff]  ;;  %v394_v34 = vld [vmem:[%s902_s4 + $0x40] sm:$0xff]  ;;  %v393_v36 = vld [vmem:[%s902_s4 + $0x38] sm:$0xff]  ;;  %p609_p13 = pneg %p608_p12 }
  0x1b   : > { %v411_v30 = vld [vmem:[%s902_s4 + $0xc8] sm:$0xff]  ;;  %v410_v35 = vld [vmem:[%s902_s4 + $0xc0] sm:$0xff]  ;;  %v409_v37 = vld [vmem:[%s902_s4 + $0xb8] sm:$0xff] }
  0x1c   : > { %v392_v38 = vld [vmem:[%s902_s4 + $0x30] sm:$0xff]  ;;  %v391_v41 = vld [vmem:[%s902_s4 + $0x28] sm:$0xff]  ;;  %v390_v46 = vld [vmem:[%s902_s4 + $0x20] sm:$0xff]  ;;  %p614_p3 = pnand %p613_p2, %p609_p13 }
  0x1d   : > { %235 = vperm.xlu1 %589, %v229_v4   ;;  %245 = vperm.xlu0 %588, %v231_v5   ;;  %v408_v39 = vld [vmem:[%s902_s4 + $0xb0] sm:$0xff]  ;;  %v407_v42 = vld [vmem:[%s902_s4 + $0xa8] sm:$0xff]  ;;  %v406_v47 = vld [vmem:[%s902_s4 + $0xa0] sm:$0xff] }
  0x1e   : > { %v255_v7 = vld.sshfl [vmem:[#allocation1] sm:$0xff pattern:$0x75316420]  ;;  %v256_v8 = vld.sshfl [vmem:[#allocation1 + $0x8] sm:$0xff pattern:$0x75316420] }
  0x1f   : > { %534 = vmatpush.msk.msra.mxu0 %vm270_vm0, %v255_v7  ;;  %539 = vmatpush.msk.msra.mxu1 %vm270_vm0, %v256_v8  ;;  %v389_v56 = vld [vmem:[%s902_s4 + $0x18] sm:$0xff]  ;;  %v388_v62 = vld [vmem:[%s902_s4 + $0x10] sm:$0xff]  ;;  %v387_v2 = vld [vmem:[%s902_s4 + $0x8] sm:$0xff] }
  0x20   : > { %535 = vmatmul.msk.f32.vlgmr.msra.gmra.mxu0 %vm257_vm1, %v224_v6  ;;  %540 = vmatmul.msk.f32.vlgmr.msra.gmra.mxu1 %vm257_vm1, %v224_v6  ;;  %v405_v57 = vld [vmem:[%s902_s4 + $0x98] sm:$0xff]  ;;  %v404_v63 = vld [vmem:[%s902_s4 + $0x90] sm:$0xff]  ;;  %v403_v3 = vld [vmem:[%s902_s4 + $0x88] sm:$0xff] }
  0x21   : > { %418 = vmatpush.msrb.mxu0 %v401_v14  ;;  %438 = vmatpush.msrb.mxu1 %v417_v15  ;;  %v341_v6 = vld [vmem:[%s901_s3] sm:$0x1] }
  0x22   : > { %v386_v7 = vld [vmem:[%s902_s4] sm:$0xff] }
  0x23   : > { %419 = vmatpush.msrb.mxu0 %v400_v16  ;;  %439 = vmatpush.msrb.mxu1 %v416_v17  ;;  %v402_v8 = vld [vmem:[%s902_s4 + $0x80] sm:$0xff] }
  0x25   : > { %420 = vmatpush.msrb.mxu0 %v399_v18  ;;  %440 = vmatpush.msrb.mxu1 %v415_v19 }
  0x27   : > { %421 = vmatpush.msrb.mxu0 %v398_v22  ;;  %441 = vmatpush.msrb.mxu1 %v414_v23 }
  0x28   : > { %536 = vmatmul.msk.f32.gmra.mxu0 %vm257_vm1, %v225_v9  ;;  %541 = vmatmul.msk.f32.gmra.mxu1 %vm257_vm1, %v225_v9 }
  0x29   : > { %422 = vmatpush.msrb.mxu0 %v397_v24  ;;  %442 = vmatpush.msrb.mxu1 %v413_v25 }
  0x2b   : > { %423 = vmatpush.msrb.mxu0 %v396_v27  ;;  %443 = vmatpush.msrb.mxu1 %v412_v28 }
  0x2d   : > { %424 = vmatpush.msrb.mxu0 %v395_v29  ;;  %444 = vmatpush.msrb.mxu1 %v411_v30 }
  0x2f   : > { %425 = vmatpush.msrb.mxu0 %v394_v34  ;;  %445 = vmatpush.msrb.mxu1 %v410_v35 }
  0x30   : > { %537 = vmatmul.msk.f32.gmra.mxu0 %vm257_vm1, %v226_v10  ;;  %542 = vmatmul.msk.f32.gmra.mxu1 %vm257_vm1, %v226_v10 }
  0x31   : > { %426 = vmatpush.msrb.mxu0 %v393_v36  ;;  %446 = vmatpush.msrb.mxu1 %v409_v37 }
  0x33   : > { %427 = vmatpush.msrb.mxu0 %v392_v38  ;;  %447 = vmatpush.msrb.mxu1 %v408_v39 }
  0x35   : > { %428 = vmatpush.msrb.mxu0 %v391_v41  ;;  %448 = vmatpush.msrb.mxu1 %v407_v42 }
  0x37   : > { %429 = vmatpush.msrb.mxu0 %v390_v46  ;;  %449 = vmatpush.msrb.mxu1 %v406_v47 }
  0x38   : > { %538 = vmatmul.msk.f32.gmra.mxu0 %vm257_vm1, %v227_v11  ;;  %543 = vmatmul.msk.f32.gmra.mxu1 %vm257_vm1, %v227_v11 }
  0x39   : > { %430 = vmatpush.msrb.mxu0 %v389_v56  ;;  %450 = vmatpush.msrb.mxu1 %v405_v57 }
  0x3b   : > { %431 = vmatpush.msrb.mxu0 %v388_v62  ;;  %451 = vmatpush.msrb.mxu1 %v404_v63 }
  0x3d   : > { %432 = vmatpush.msrb.mxu0 %v387_v2  ;;  %452 = vmatpush.msrb.mxu1 %v403_v3 }
  0x3f   : > { %433 = vmatpush.msrb.mxu0 %v386_v7  ;;  %453 = vmatpush.msrb.mxu1 %v402_v8 }
  0x87   : > { %v251_v26 = vpop.permute.xlu0 %250  ;;  %v241_v31 = vpop.permute.xlu1 %240 }
  0x8f   : > { %v246_v40 = vpop.permute.xlu0 %245  ;;  %v236_v51 = vpop.permute.xlu1 %235 }
  0x9d   : > { %v761_v12 = vpop.f32.mrf.mxu0  ;;  %v763_v13 = vpop.f32.mrf.mxu1 }
  0x9e   : > { %v293_v58 = vadd.f32 %v761_v12, %v236_v51  ;;  %v322_v59 = vadd.f32 %v763_v13, %v236_v51 }
  0xa0   : > { %v333_v4 = vmax.f32 %v293_v58, 0.0  ;;  %v334_v5 = vmax.f32 %v322_v59, 0.0 }
  0xa5   : > { %v295_v20 = vpop.f32.mrf.mxu0  ;;  %v324_v21 = vpop.f32.mrf.mxu1 }
  0xa6   : > { %v296_v52 = vadd.f32 %v295_v20, %v241_v31  ;;  %v325_v53 = vadd.f32 %v324_v21, %v241_v31 }
  0xa8   : > { %v335_v0 = vmax.f32 %v296_v52, 0.0  ;;  %v336_v1 = vmax.f32 %v325_v53, 0.0 }
  0xad   : > { %v298_v32 = vpop.f32.mrf.mxu0  ;;  %v327_v33 = vpop.f32.mrf.mxu1 }
  0xae   : > { %v299_v43 = vadd.f32 %v298_v32, %v246_v40  ;;  %v328_v48 = vadd.f32 %v327_v33, %v246_v40 }
  0xb0   : > { %v337_v60 = vmax.f32 %v299_v43, 0.0  ;;  %v338_v61 = vmax.f32 %v328_v48, 0.0 }
  0xb5   : > { %v301_v44 = vpop.f32.mrf.mxu0  ;;  %v330_v45 = vpop.f32.mrf.mxu1 }
  0xb6   : > { %v302_v49 = vadd.f32 %v301_v44, %v251_v26  ;;  %v331_v50 = vadd.f32 %v330_v45, %v251_v26 }
  0xb8   : > { %v339_v54 = vmax.f32 %v302_v49, 0.0  ;;  %v340_v55 = vmax.f32 %v331_v50, 0.0 }
  0xba   : > { %358 = vmatpush.msra.mxu2 %v339_v54  ;;  %378 = vmatpush.msra.mxu3 %v340_v55 }
  0xbc   : > { %359 = vmatpush.msra.mxu2 %v337_v60  ;;  %379 = vmatpush.msra.mxu3 %v338_v61 }
  0xbe   : > { %360 = vmatpush.msra.mxu2 %v335_v0  ;;  %380 = vmatpush.msra.mxu3 %v336_v1 }
  0xc0   : > { %361 = vmatpush.msra.mxu2 %v333_v4  ;;  %381 = vmatpush.msra.mxu3 %v334_v5 }
  0xc1   : > { %544 = vmatmul.msk.f32.vlgmr.msra.gmra.mxu2 %vm342_vm2, %v341_v6  ;;  %545 = vmatmul.msk.f32.vlgmr.msra.gmra.mxu3 %vm342_vm2, %v341_v6 }
 0x144   : > { %v363_v9 = vpop.f32.mrf.mxu2  ;;  %v383_v10 = vpop.f32.mrf.mxu3 }
 0x145   : > { %434 = vmatmul.f32.vlgmr.msrb.gmra.mxu0 %v363_v9  ;;  %454 = vmatmul.f32.vlgmr.msrb.gmra.mxu1 %v383_v10 }
 0x1c2   : > { %v435_v11 = vpop.f32.mrf.mxu0  ;;  %v455_v12 = vpop.f32.mrf.mxu1 }
 0x1c3   : > { %v456_v13 = vadd.f32 %v455_v12, %v435_v11 }
 0x1c5   : > { %459 = vst.msk [vmem:[%s217_s16] sm:$0x1] %vm458_vm3, %v456_v13 }
 0x1c6   : > { %617 = shalt.err (!%p614_p3)
}
 0x1c7   : > { %548 = dma.vmem_to_hbm [thread:$0]  (%p723_p5), %s472_s17, 16, %s474_s23, %s461_s25  }
 0x1c8 PF: > { %p554_p4 = scmp.ge.s32.totalorder %s652_s21, 2  ;;  %s485_s10 = sand.u32 1, %s640_s18  }
 0x1c9   : > { %s486_s11 = scalar_lea.sflag [#allocation3], %s485_s10 }
 0x1ca   : > { %p551_p7 = pnand %p554_p4, %p727_p6 }
 0x1cc   : > { %p552_p8 = pneg %p551_p7 }
 0x1ce   : > { %635 = dma.done.wait (%p552_p8), %s486_s11, 16  }
 0x1cf   : > { %637 = vsyncadd (%p552_p8), %s486_s11, 4294967280  ;;  %p15_p9 = scmp.ge.s32.totalorder %s710_s24, 4   ;;  %s906_s18 = smov %s644_s19 }
 0x1d0   : > { %s907_s19 = smov %s648_s20  ;;  %s908_s20 = smov %s721_s27 }
 0x1d1   : > { %s909_s21 = smov %s710_s24  ;;  %17 = sbr.rel (!%p15_p9) target bundleno = 3 (0x3), region = 75 }
 0x1d6   :  { %491 = vsyncpa [#allocation3], 1 }
 0x1d7   :  { %493 = vsyncpa [#allocation3 + $0x1], 1 }

</bundles_post_ra>
